<compile_context>
chip_gen: v6e
topology: v6e:2x2x1
jax: 0.10.0
libtpu: 0.0.40
codegen_flags: <defaults>
</compile_context>

<pallas_src>
from functools import partial

import jax
import jax.numpy as jnp
from jax.experimental import pallas as pl
from jax.experimental.pallas import tpu as pltpu


# ----------------------------------------------------------------------------
# VMEM planning (generation-aware)
# ----------------------------------------------------------------------------

def _vmem_plan():
    """Return (vmem_limit_bytes, vmem_budget_bytes) for this TPU generation."""
    cap = None
    try:
        info = pltpu.get_tpu_info()
        cap = getattr(info, "vmem_capacity_bytes", None)
    except Exception:  # pragma: no cover - be robust to API/runtime differences
        cap = None
    if not cap or cap <= 0:
        cap = 64 * (1 << 20)  # conservative default: v7x physical VMEM per TC
    vmem_limit = int(cap * 3 // 4)   # leave headroom for compiler scratch
    vmem_budget = int(cap // 2)      # what the tile-size model plans against
    return vmem_limit, vmem_budget


# ----------------------------------------------------------------------------
# Fast path: whole N-column block resident in VMEM, 1-D grid over I
# ----------------------------------------------------------------------------

def _normalize_block_kernel(x_ref, o_ref):
    # x_ref / o_ref: one (N, TILE_I) column tile resident in VMEM.
    n = x_ref.shape[0]
    # Column mean accumulated in f32 (no full f32 copy needed for the sum).
    mean = jnp.sum(x_ref[...], axis=0, dtype=jnp.float32, keepdims=True) * (1.0 / n)
    # Diff-based (numerically robust) unbiased variance, matching torch std.
    diff = x_ref[...].astype(jnp.float32) - mean
    var = jnp.sum(diff * diff, axis=0, keepdims=True) * (1.0 / (n - 1))
    inv_std = jax.lax.rsqrt(var)                 # EUP rsqrt on a (1, TILE_I) row
    o_ref[...] = (diff * inv_std).astype(o_ref.dtype)


def _pick_tile_i(N, I, itemsize, vmem_budget_bytes):
    """Largest lane-aligned column tile fitting VMEM; None if infeasible."""
    # Per-column VMEM bytes:
    #   input + output blocks, double-buffered : 4 * N * itemsize
    #   f32 `diff` temporary                   : 4 * N
    #   f32 upcast of the block (sub-32-bit)   : 4 * N
    per_col = 4 * N * itemsize + 4 * N
    if itemsize < 4:
        per_col += 4 * N
    if I <= 128:
        # Block last dim equal to the full dim is always legal.
        return I if per_col * I <= vmem_budget_bytes else None
    max_cols = vmem_budget_bytes // per_col
    if max_cols < 128:
        return None                      # even one lane-dense tile won't fit
    tile = min(I, (max_cols // 128) * 128)
    if I >= 256:
        # Keep >= 2 grid steps so the "parallel" axis shards across both
        # TensorCores on v7x (negligible cost on single-TC v5e/v6e).
        half_aligned = ((pl.cdiv(I, 2) + 127) // 128) * 128
        tile = min(tile, half_aligned)
    return max(tile, 128)


def _single_pass(x2, tile_i, vmem_limit):
    N, I = x2.shape
    itemsize = jnp.dtype(x2.dtype).itemsize
    grid = (pl.cdiv(I, tile_i),)
    cost = pl.CostEstimate(
        flops=int(5 * N * I),
        transcendentals=int(I),
        bytes_accessed=int(2 * N * I * itemsize),
    )
    return pl.pallas_call(
        _normalize_block_kernel,
        out_shape=jax.ShapeDtypeStruct((N, I), x2.dtype),
        grid=grid,
        in_specs=[pl.BlockSpec((N, tile_i), lambda j: (0, j))],
        out_specs=pl.BlockSpec((N, tile_i), lambda j: (0, j)),
        compiler_params=pltpu.CompilerParams(
            dimension_semantics=("parallel",),
            vmem_limit_bytes=vmem_limit,
        ),
        cost_estimate=cost,
    )(x2)


# ----------------------------------------------------------------------------
# Fallback: two-pass (stats, then apply) for large N
# ----------------------------------------------------------------------------

def _stats_kernel(x_ref, mean_ref, istd_ref, sum_sc, sumsq_sc, *, n_rows, tile_n):
    ni = pl.program_id(1)                       # reduction axis (last grid axis)

    @pl.when(ni == 0)
    def _():
        sum_sc[...] = jnp.zeros_like(sum_sc)
        sumsq_sc[...] = jnp.zeros_like(sumsq_sc)

    x = x_ref[...].astype(jnp.float32)
    # Mask rows past N (the last row block may be partial and padded with
    # unspecified data).
    row_ids = jax.lax.broadcasted_iota(jnp.int32, x.shape, 0)
    valid = (ni * tile_n + row_ids) < n_rows
    x = jnp.where(valid, x, 0.0)

    sum_sc[...] += jnp.sum(x, axis=0, keepdims=True)
    sumsq_sc[...] += jnp.sum(x * x, axis=0, keepdims=True)

    @pl.when(ni == pl.num_programs(1) - 1)
    def _():
        mean = sum_sc[...] * (1.0 / n_rows)
        var = (sumsq_sc[...] - n_rows * mean * mean) * (1.0 / (n_rows - 1))
        mean_ref[...] = mean
        istd_ref[...] = jax.lax.rsqrt(var)


def _apply_kernel(x_ref, mean_ref, istd_ref, o_ref):
    x = x_ref[...].astype(jnp.float32)
    o_ref[...] = ((x - mean_ref[...]) * istd_ref[...]).astype(o_ref.dtype)


def _pick_tile_n(N, tile_i, itemsize, vmem_budget_bytes, max_tile_n=None,
                 target_block_bytes=4 * (1 << 20)):
    # Per-row VMEM bytes of a (tile_n, tile_i) block (pass 2 is the worst):
    #   in + out double-buffered + one f32 temporary.
    per_row = tile_i * (4 * itemsize + 4)
    rows_budget = max(8, vmem_budget_bytes // per_row)
    rows_target = max(8, target_block_bytes // (tile_i * itemsize))
    tile_n = min(rows_budget, rows_target)
    if max_tile_n is not None:
        tile_n = min(tile_n, max_tile_n)
    if tile_n >= N:
        return N                                # full dim is always legal
    return max(8, (tile_n // 8) * 8)


def _two_pass(x2, vmem_limit, vmem_budget, max_tile_n=None):
    N, I = x2.shape
    itemsize = jnp.dtype(x2.dtype).itemsize
    tile_i = I if I <= 128 else min(512, 128 * (I // 128))
    tile_n = _pick_tile_n(N, tile_i, itemsize, vmem_budget, max_tile_n)
    n_i = pl.cdiv(I, tile_i)
    n_n = pl.cdiv(N, tile_n)

    # Pass 1: per-column sum / sum-of-squares -> mean, inv_std (f32, shape (1, I)).
    mean, istd = pl.pallas_call(
        partial(_stats_kernel, n_rows=N, tile_n=tile_n),
        out_shape=(
            jax.ShapeDtypeStruct((1, I), jnp.float32),
            jax.ShapeDtypeStruct((1, I), jnp.float32),
        ),
        grid=(n_i, n_n),
        in_specs=[pl.BlockSpec((tile_n, tile_i), lambda ii, ni: (ni, ii))],
        out_specs=(
            pl.BlockSpec((1, tile_i), lambda ii, ni: (0, ii)),
            pl.BlockSpec((1, tile_i), lambda ii, ni: (0, ii)),
        ),
        scratch_shapes=[
            pltpu.VMEM((1, tile_i), jnp.float32),
            pltpu.VMEM((1, tile_i), jnp.float32),
        ],
        compiler_params=pltpu.CompilerParams(
            dimension_semantics=("parallel", "arbitrary"),
            vmem_limit_bytes=vmem_limit,
        ),
        cost_estimate=pl.CostEstimate(
            flops=int(4 * N * I),
            transcendentals=int(I),
            bytes_accessed=int(N * I * itemsize + 8 * I),
        ),
    )(x2)

    # Pass 2: re-read x and apply (x - mean) * inv_std.
    out2 = pl.pallas_call(
        _apply_kernel,
        out_shape=jax.ShapeDtypeStruct((N, I), x2.dtype),
        grid=(n_n, n_i),
        in_specs=[
            pl.BlockSpec((tile_n, tile_i), lambda ni, ii: (ni, ii)),
            pl.BlockSpec((1, tile_i), lambda ni, ii: (0, ii)),
            pl.BlockSpec((1, tile_i), lambda ni, ii: (0, ii)),
        ],
        out_specs=pl.BlockSpec((tile_n, tile_i), lambda ni, ii: (ni, ii)),
        compiler_params=pltpu.CompilerParams(
            dimension_semantics=("parallel", "parallel"),
            vmem_limit_bytes=vmem_limit,
        ),
        cost_estimate=pl.CostEstimate(
            flops=int(2 * N * I),
            transcendentals=0,
            bytes_accessed=int(2 * N * I * itemsize + 8 * I),
        ),
    )(x2, mean, istd)
    return out2


# ----------------------------------------------------------------------------
# Public wrapper
# ----------------------------------------------------------------------------

def normalizer_1d_forward(x, *, force_two_pass=False, _max_tile_n=None):
    """x: (B, D, I) -> normalized (B, D, I), like Normalizer_1D.forward."""
    B, D, I = x.shape
    N = B * D
    assert N > 1, "std with ddof=1 requires at least 2 rows"
    x2 = x.reshape(N, I)

    itemsize = jnp.dtype(x.dtype).itemsize
    vmem_limit, vmem_budget = _vmem_plan()

    tile_i = None if force_two_pass else _pick_tile_i(N, I, itemsize, vmem_budget)
    if tile_i is not None:
        out2 = _single_pass(x2, tile_i, vmem_limit)
    else:
        out2 = _two_pass(x2, vmem_limit, vmem_budget, max_tile_n=_max_tile_n)

    # NOTE: if the caller can donate x, input_output_aliases={0: 0} on the
    # pallas_call would avoid a second N*I HBM buffer (no bandwidth change).
    return out2.reshape(B, D, I)


# ----------------------------------------------------------------------------
# Reference + self-test
# ----------------------------------------------------------------------------

def _reference(x):
    B, D, I = x.shape
    x2 = x.reshape(-1, I)
    mean = x2.mean(axis=0)
    std = x2.std(axis=0, ddof=1)
    return ((x2 - mean) / std).reshape(B, D, I)


if __name__ == "__main__":
    key = jax.random.PRNGKey(0)

    # Case 1: small module-like shape (single column tile, last dim < 128).
    B, D, I = 2, 4, 16
    x_small = jax.random.normal(key, (B, D, I), dtype=jnp.float32)
    out_small = jax.block_until_ready(normalizer_1d_forward(x_small))
    assert out_small.shape == (B, D, I)
    assert jnp.allclose(out_small, _reference(x_small), atol=1e-5, rtol=1e-5), \
        "mismatch vs reference (small, single-pass)"

    # Case 2: lane-aligned shape exercising the tiled, parallel fast path
    # (tile_i capped to keep >= 2 grid steps for dual-TC sharding).
    B2, D2, I2 = 2, 8, 1024
    x_big = jax.random.normal(jax.random.PRNGKey(0), (B2, D2, I2), dtype=jnp.float32)
    out_big = jax.block_until_ready(normalizer_1d_forward(x_big))
    assert out_big.shape == (B2, D2, I2)
    assert jnp.allclose(out_big, _reference(x_big), atol=1e-5, rtol=1e-5), \
        "mismatch vs reference (tiled, single-pass)"

    # Case 3: force the two-pass large-N fallback with a small row tile so the
    # "arbitrary" reduction axis, pl.when init/finalize and partial-row masking
    # are all exercised (N=20 rows, tile_n=8 -> 3 row blocks, last one partial).
    B3, D3, I3 = 4, 5, 16
    x_tp = jax.random.normal(jax.random.PRNGKey(0), (B3, D3, I3), dtype=jnp.float32)
    out_tp = jax.block_until_ready(
        normalizer_1d_forward(x_tp, force_two_pass=True, _max_tile_n=8))
    assert out_tp.shape == (B3, D3, I3)
    assert jnp.allclose(out_tp, _reference(x_tp), atol=1e-5, rtol=1e-5), \
        "mismatch vs reference (two-pass, masked rows)"

    # Case 4: two-pass fallback with multiple column tiles (tile_i=512, 2 tiles).
    out_tp2 = jax.block_until_ready(
        normalizer_1d_forward(x_big, force_two_pass=True))
    assert jnp.allclose(out_tp2, _reference(x_big), atol=1e-5, rtol=1e-5), \
        "mismatch vs reference (two-pass, tiled columns)"

    print("KERNEL_OK")
</pallas_src>

<mosaic_0001>
module attributes {stable_mosaic.version = 11 : i64} {
  func.func @_normalize_block_kernel(%arg0: i32, %arg1: memref<8x16xf32, #tpu.memory_space<vmem>>, %arg2: memref<8x16xf32, #tpu.memory_space<vmem>>) attributes {dimension_semantics = [#tpu.dimension_semantics<parallel>], iteration_bounds = array<i64: 1>, scalar_prefetch = 0 : i64, scratch_operands = 0 : i64, tpu.core_type = #tpu.core_type<tc>, window_params = [{transform_indices = @transform_0, window_bounds = array<i64: 8, 16>}, {transform_indices = @transform_1, window_bounds = array<i64: 8, 16>}]} {
    %c0 = arith.constant 0 : index
    %c0_0 = arith.constant 0 : index
    %0 = vector.load %arg1[%c0, %c0_0] : memref<8x16xf32, #tpu.memory_space<vmem>>, vector<8x16xf32>
    %cst = arith.constant dense<0.000000e+00> : vector<16xf32>
    %1 = vector.multi_reduction <add>, %0, %cst [0] : vector<8x16xf32> to vector<16xf32>
    %2 = vector.shape_cast %1 : vector<16xf32> to vector<1x16xf32>
    %cst_1 = arith.constant 1.250000e-01 : f32
    %3 = vector.broadcast %cst_1 : f32 to vector<1x16xf32>
    %4 = arith.mulf %2, %3 : vector<1x16xf32>
    %c0_2 = arith.constant 0 : index
    %c0_3 = arith.constant 0 : index
    %5 = vector.load %arg1[%c0_2, %c0_3] : memref<8x16xf32, #tpu.memory_space<vmem>>, vector<8x16xf32>
    %6 = vector.broadcast %4 : vector<1x16xf32> to vector<8x16xf32>
    %7 = arith.subf %5, %6 : vector<8x16xf32>
    %8 = arith.mulf %7, %7 : vector<8x16xf32>
    %cst_4 = arith.constant dense<0.000000e+00> : vector<16xf32>
    %9 = vector.multi_reduction <add>, %8, %cst_4 [0] : vector<8x16xf32> to vector<16xf32>
    %10 = vector.shape_cast %9 : vector<16xf32> to vector<1x16xf32>
    %cst_5 = arith.constant 0.142857149 : f32
    %11 = vector.broadcast %cst_5 : f32 to vector<1x16xf32>
    %12 = arith.mulf %10, %11 : vector<1x16xf32>
    %13 = math.rsqrt %12 : vector<1x16xf32>
    %14 = vector.broadcast %13 : vector<1x16xf32> to vector<8x16xf32>
    %15 = arith.mulf %7, %14 : vector<8x16xf32>
    %c0_6 = arith.constant 0 : index
    %c0_7 = arith.constant 0 : index
    %16 = vector.load %arg2[%c0_6, %c0_7] : memref<8x16xf32, #tpu.memory_space<vmem>>, vector<8x16xf32>
    tpu.vector_store %arg2[%c0_6, %c0_7], %15 {strides = array<i32>} : memref<8x16xf32, #tpu.memory_space<vmem>>, vector<8x16xf32>,
    return
  }
  func.func @transform_0(%arg0: i32) -> (i32, i32) {
    %c0_i32 = arith.constant 0 : i32
    %c0_i32_0 = arith.constant 0 : i32
    return %c0_i32, %arg0 : i32, i32
  }
  func.func @transform_1(%arg0: i32) -> (i32, i32) {
    %c0_i32 = arith.constant 0 : i32
    %c0_i32_0 = arith.constant 0 : i32
    return %c0_i32, %arg0 : i32, i32
  }
}

</mosaic_0001>

<bundles_post_ra>
// kernel: tpu_custom_call.1
= control target key start
LH: loop header
LB: loop body
LE: loop exit
PB: predicated region body
PF: predicated region fallthrough
CT: control target
= control target key end

     0   :  { %6 = vsyncpa [#allocation3], 0  ;;  %s128_s0 = inlined_call_operand.hbm [shape: f32[8,16], index: 0, kind: input, shape index: {}]   ;;  %s129_s1 = inlined_call_operand.hbm [shape: f32[8,16], index: 1, kind: output, shape index: {}]  }
   0x1   :  { %7 = vsyncpa [#allocation4], 0  ;;  %s107_s6 = smov [#allocation2]  }
   0x2   :  { %s14_s7 = sshll.u32 %s107_s6, 4  ;;  %s15_s7 = int_to_ptr.vmem [resolvable:$true] %s14_s7 }
   0x3   :  { %s71_s8 = scalar_lea.vmem %s15_s7, 128  ;;  %p76_p1 = scmp.lt.s32.totalorder %s15_s7, %s15_s7 }
   0x4   :  { %p72_p0 = scmp.ne.s32.totalorder %s15_s7, %s71_s8  ;;  %p77_p2 = scmp.lt.s32.totalorder %s71_s8, %s71_s8 }
   0x6   :  { %p78_p3 = por %p77_p2, %p76_p1 }
   0x8   :  { %p79_p4 = pnand %p78_p3, %p72_p0 }
   0xa   :  { %82 = shalt.err (!%p79_p4)
}
   0xb   :  { %17 = dma.hbm_to_vmem [thread:$0]  %s128_s0, 128, %s15_s7, [#allocation3]  }
   0xc   :  { %103 = dma.done.wait [#allocation3], 128  }
   0xd   :  { %104 = vsyncadd [#allocation3], 4294967168  ;;  %vm22_vm0 = vcmask 130048   ;;  %v21_v0 = vld [vmem:[#allocation2] sm:$0xff]  ;;  %s108_s0 = smov [#allocation5]  }
   0xe   :  { %v23_v1 = vsel %vm22_vm0, %v21_v0, 0.0  ;;  %s50_s11 = sshll.u32 %s108_s0, 4  ;;  %s51_s11 = int_to_ptr.vmem [resolvable:$true] %s50_s11 }
   0xf   :  { %v24_v2 = vrot.slane %v23_v1, 4  ;;  %s83_s12 = scalar_lea.vmem %s51_s11, 128  ;;  %p88_p6 = scmp.lt.s32.totalorder %s51_s11, %s51_s11 }
  0x10   :  { %p84_p5 = scmp.ne.s32.totalorder %s51_s11, %s83_s12  ;;  %p89_p7 = scmp.lt.s32.totalorder %s83_s12, %s83_s12 }
  0x11   :  { %v25_v3 = vadd.f32 %v24_v2, %v23_v1 }
  0x12   :  { %p90_p8 = por %p89_p7, %p88_p6 }
  0x13   :  { %v26_v4 = vrot.slane %v25_v3, 2 }
  0x14   :  { %p91_p9 = pnand %p90_p8, %p84_p5 }
  0x15   :  { %v27_v5 = vadd.f32 %v26_v4, %v25_v3 }
  0x17   :  { %v28_v6 = vrot.slane %v27_v5, 1 }
  0x19   :  { %v29_v7 = vadd.f32 %v28_v6, %v27_v5 }
  0x1b   :  { %v30_v8 = vmul.f32 0.125, %v29_v7 }
  0x1d   :  { %v31_v9 = vsub.f32 %v21_v0, %v30_v8 }
  0x1f   :  { %v32_v10 = vmul.f32 %v31_v9, %v31_v9 }
  0x21   :  { %v33_v11 = vsel %vm22_vm0, %v32_v10, 0.0 }
  0x22   :  { %v34_v12 = vrot.slane %v33_v11, 4 }
  0x24   :  { %v35_v13 = vadd.f32 %v34_v12, %v33_v11 }
  0x26   :  { %v36_v14 = vrot.slane %v35_v13, 2 }
  0x28   :  { %v37_v15 = vadd.f32 %v36_v14, %v35_v13 }
  0x2a   :  { %v38_v16 = vrot.slane %v37_v15, 1 }
  0x2c   :  { %v39_v17 = vadd.f32 %v38_v16, %v37_v15 }
  0x2e   :  { %v40_v18 = vmul.f32 0.14285715, %v39_v17 }
  0x30   :  { %61 = vrsqrt.f32 %v40_v18 }
  0x3d   :  { %v62_v19 = vpop.eup %61 }
  0x3e   :  { %v42_v20 = vmul.f32 %v62_v19, %v31_v9 }
  0x40   :  { %43 = vst.msk [vmem:[#allocation5] sm:$0xff] %vm22_vm0, %v42_v20 }
  0x41   :  { %94 = shalt.err (!%p91_p9)
}
  0x42   :  { %53 = dma.vmem_to_hbm [thread:$0]  %s51_s11, 128, %s129_s1, [#allocation4]  }
  0x43   :  { %105 = dma.done.wait [#allocation4], 128  }
  0x44   :  { %106 = vsyncadd [#allocation4], 4294967168 }
  0x45   :  { %57 = vsyncpa [#allocation3], 1 }
  0x46   :  { %58 = vsyncpa [#allocation4], 1 }

</bundles_post_ra>
